<compile_context>
chip_gen: v7x
topology: tpu7x:2x2x1
jax: 0.10.0
libtpu: 0.0.40
codegen_flags: <defaults>
</compile_context>

<pallas_src>
import jax
import jax.numpy as jnp
from jax.experimental import pallas as pl
from jax.experimental.pallas import tpu as pltpu


def rnn_model_forward(x_btf, w_ih, w_hh, b_ih, b_hh, w_lin, b_lin, h0=None):
    """Forward of RNNModel.

    x_btf : (B, T, F) batch-first input, like torch nn.RNN(batch_first=True).
    h0    : (B, H) initial hidden state; None == reset_hidden() (zeros).

    Returns (pred, h_T):
      pred = Linear(rnn_out)[:, -1]   shape (B, O)
      h_T  = final hidden state       shape (B, H)   (== module's self.hidden)
    """
    B, T, F = x_btf.shape
    H = w_ih.shape[0]
    O = w_lin.shape[0]

    if h0 is None:
        h0 = jnp.zeros((B, H), jnp.float32)

    # Layout prep (cheap XLA layout ops, outside the kernel): time-major then
    # flatten so the input projection is ONE (T*B, F) @ (F, H) matmul.
    x_flat = jnp.transpose(x_btf, (1, 0, 2)).reshape(T * B, F)   # row = t*B + b
    wih_t = w_ih.T.astype(jnp.float32)                           # (F, H)
    whh_t = w_hh.T.astype(jnp.float32)                           # (H, H)
    b_rnn = (b_ih + b_hh).reshape(1, H).astype(jnp.float32)      # (1, H)
    wlin_t = w_lin.T.astype(jnp.float32)                         # (H, O)
    blin = b_lin.reshape(1, O).astype(jnp.float32)               # (1, O)

    def kernel(x_ref, h0_ref, wih_ref, whh_ref, b_ref, wlin_ref, blin_ref,
               out_ref, ht_ref):
        # 1) Hoisted input projection for ALL timesteps at once:
        #    (T*B, F) @ (F, H) + b   -- one large-M MXU matmul.
        p = (jnp.dot(x_ref[...], wih_ref[...],
                     preferred_element_type=jnp.float32) + b_ref[...])

        # 2) Serial recurrence, fully unrolled over the static T.  Only the
        #    W_hh matmul remains on the (inherently serial) critical path;
        #    batch rides in the vreg sublanes.
        whh = whh_ref[...]
        h = h0_ref[...]
        for t in range(T):
            p_t = p[t * B:(t + 1) * B, :]                         # static slice
            h = jnp.tanh(p_t + jnp.dot(h, whh,
                                       preferred_element_type=jnp.float32))

        # 3) Final linear applied only to the last hidden state (== pred[:, -1]).
        ht_ref[...] = h.astype(ht_ref.dtype)
        out_ref[...] = (jnp.dot(h, wlin_ref[...],
                                preferred_element_type=jnp.float32)
                        + blin_ref[...]).astype(out_ref.dtype)

    vmem = pl.BlockSpec(memory_space=pltpu.MemorySpace.VMEM)
    pred, h_t = pl.pallas_call(
        kernel,
        out_shape=(jax.ShapeDtypeStruct((B, O), jnp.float32),
                   jax.ShapeDtypeStruct((B, H), jnp.float32)),
        in_specs=[vmem] * 7,
        out_specs=(vmem, vmem),
    )(x_flat, h0.astype(jnp.float32), wih_t, whh_t, b_rnn, wlin_t, blin)
    return pred, h_t


def _reference(x_btf, w_ih, w_hh, b_ih, b_hh, w_lin, b_lin):
    """Pure-JAX reference mirroring torch.nn.RNN + Linear, returning
    (pred[:, -1], final hidden)."""
    B, T, F = x_btf.shape
    H = w_ih.shape[0]
    h = jnp.zeros((B, H), jnp.float32)
    for t in range(T):
        h = jnp.tanh(x_btf[:, t] @ w_ih.T + b_ih + h @ w_hh.T + b_hh)
    return h @ w_lin.T + b_lin, h


if __name__ == "__main__":
    # Small shapes consistent with the module's forward.
    B, T, F, H, O = 2, 8, 4, 32, 8

    key = jax.random.PRNGKey(0)
    ks = jax.random.split(key, 7)
    bound = 1.0 / jnp.sqrt(H)
    u = lambda k, shp: jax.random.uniform(k, shp, jnp.float32, -bound, bound)

    x = jax.random.normal(ks[0], (B, T, F), jnp.float32)
    w_ih = u(ks[1], (H, F))    # nn.RNN weight_ih_l0
    w_hh = u(ks[2], (H, H))    # nn.RNN weight_hh_l0
    b_ih = u(ks[3], (H,))
    b_hh = u(ks[4], (H,))
    w_lin = u(ks[5], (O, H))   # nn.Linear weight
    b_lin = u(ks[6], (O,))     # nn.Linear bias

    pred, h_t = rnn_model_forward(x, w_ih, w_hh, b_ih, b_hh, w_lin, b_lin)
    pred = jax.block_until_ready(pred)
    h_t = jax.block_until_ready(h_t)

    ref_pred, ref_h = _reference(x, w_ih, w_hh, b_ih, b_hh, w_lin, b_lin)
    assert pred.shape == (B, O)
    assert h_t.shape == (B, H)
    assert jnp.allclose(pred, ref_pred, atol=1e-5, rtol=1e-5), "pred mismatch"
    assert jnp.allclose(h_t, ref_h, atol=1e-5, rtol=1e-5), "hidden mismatch"
    print("KERNEL_OK")
</pallas_src>

<mosaic_0001>
module attributes {stable_mosaic.version = 11 : i64} {
  func.func @kernel(%arg0: memref<16x4xf32, #tpu.memory_space<vmem>>, %arg1: memref<2x32xf32, #tpu.memory_space<vmem>>, %arg2: memref<4x32xf32, #tpu.memory_space<vmem>>, %arg3: memref<32x32xf32, #tpu.memory_space<vmem>>, %arg4: memref<1x32xf32, #tpu.memory_space<vmem>>, %arg5: memref<32x8xf32, #tpu.memory_space<vmem>>, %arg6: memref<1x8xf32, #tpu.memory_space<vmem>>, %arg7: memref<2x8xf32, #tpu.memory_space<vmem>>, %arg8: memref<2x32xf32, #tpu.memory_space<vmem>>) attributes {dimension_semantics = [], scalar_prefetch = 0 : i64, scratch_operands = 0 : i64, tpu.core_type = #tpu.core_type<tc>} {
    %c0 = arith.constant 0 : index
    %c0_0 = arith.constant 0 : index
    %0 = vector.load %arg0[%c0, %c0_0] : memref<16x4xf32, #tpu.memory_space<vmem>>, vector<16x4xf32>
    %c0_1 = arith.constant 0 : index
    %c0_2 = arith.constant 0 : index
    %1 = vector.load %arg2[%c0_1, %c0_2] : memref<4x32xf32, #tpu.memory_space<vmem>>, vector<4x32xf32>
    %cst = arith.constant dense<0.000000e+00> : vector<16x32xf32>
    %2 = tpu.matmul %0, %1, %cst {dimension_numbers = #tpu.dot_dimension_numbers<[1], [0], [0], [1], [0, 0, 1, 1], [], []>} : vector<16x4xf32>, vector<4x32xf32>, vector<16x32xf32> -> vector<16x32xf32>
    %c0_3 = arith.constant 0 : index
    %c0_4 = arith.constant 0 : index
    %3 = vector.load %arg4[%c0_3, %c0_4] : memref<1x32xf32, #tpu.memory_space<vmem>>, vector<1x32xf32>
    %4 = vector.broadcast %3 : vector<1x32xf32> to vector<16x32xf32>
    %5 = arith.addf %2, %4 : vector<16x32xf32>
    %c0_5 = arith.constant 0 : index
    %c0_6 = arith.constant 0 : index
    %6 = vector.load %arg3[%c0_5, %c0_6] : memref<32x32xf32, #tpu.memory_space<vmem>>, vector<32x32xf32>
    %c0_7 = arith.constant 0 : index
    %c0_8 = arith.constant 0 : index
    %7 = vector.load %arg1[%c0_7, %c0_8] : memref<2x32xf32, #tpu.memory_space<vmem>>, vector<2x32xf32>
    %8 = vector.extract_strided_slice %5 {offsets = [0, 0], sizes = [2, 32], strides = [1, 1]} : vector<16x32xf32> to vector<2x32xf32>
    %cst_9 = arith.constant dense<0.000000e+00> : vector<2x32xf32>
    %9 = tpu.matmul %7, %6, %cst_9 {dimension_numbers = #tpu.dot_dimension_numbers<[1], [0], [0], [1], [0, 0, 1, 1], [], []>} : vector<2x32xf32>, vector<32x32xf32>, vector<2x32xf32> -> vector<2x32xf32>
    %10 = arith.addf %8, %9 : vector<2x32xf32>
    %11 = math.tanh %10 : vector<2x32xf32>
    %12 = vector.extract_strided_slice %5 {offsets = [2, 0], sizes = [2, 32], strides = [1, 1]} : vector<16x32xf32> to vector<2x32xf32>
    %cst_10 = arith.constant dense<0.000000e+00> : vector<2x32xf32>
    %13 = tpu.matmul %11, %6, %cst_10 {dimension_numbers = #tpu.dot_dimension_numbers<[1], [0], [0], [1], [0, 0, 1, 1], [], []>} : vector<2x32xf32>, vector<32x32xf32>, vector<2x32xf32> -> vector<2x32xf32>
    %14 = arith.addf %12, %13 : vector<2x32xf32>
    %15 = math.tanh %14 : vector<2x32xf32>
    %16 = vector.extract_strided_slice %5 {offsets = [4, 0], sizes = [2, 32], strides = [1, 1]} : vector<16x32xf32> to vector<2x32xf32>
    %cst_11 = arith.constant dense<0.000000e+00> : vector<2x32xf32>
    %17 = tpu.matmul %15, %6, %cst_11 {dimension_numbers = #tpu.dot_dimension_numbers<[1], [0], [0], [1], [0, 0, 1, 1], [], []>} : vector<2x32xf32>, vector<32x32xf32>, vector<2x32xf32> -> vector<2x32xf32>
    %18 = arith.addf %16, %17 : vector<2x32xf32>
    %19 = math.tanh %18 : vector<2x32xf32>
    %20 = vector.extract_strided_slice %5 {offsets = [6, 0], sizes = [2, 32], strides = [1, 1]} : vector<16x32xf32> to vector<2x32xf32>
    %cst_12 = arith.constant dense<0.000000e+00> : vector<2x32xf32>
    %21 = tpu.matmul %19, %6, %cst_12 {dimension_numbers = #tpu.dot_dimension_numbers<[1], [0], [0], [1], [0, 0, 1, 1], [], []>} : vector<2x32xf32>, vector<32x32xf32>, vector<2x32xf32> -> vector<2x32xf32>
    %22 = arith.addf %20, %21 : vector<2x32xf32>
    %23 = math.tanh %22 : vector<2x32xf32>
    %24 = vector.extract_strided_slice %5 {offsets = [8, 0], sizes = [2, 32], strides = [1, 1]} : vector<16x32xf32> to vector<2x32xf32>
    %cst_13 = arith.constant dense<0.000000e+00> : vector<2x32xf32>
    %25 = tpu.matmul %23, %6, %cst_13 {dimension_numbers = #tpu.dot_dimension_numbers<[1], [0], [0], [1], [0, 0, 1, 1], [], []>} : vector<2x32xf32>, vector<32x32xf32>, vector<2x32xf32> -> vector<2x32xf32>
    %26 = arith.addf %24, %25 : vector<2x32xf32>
    %27 = math.tanh %26 : vector<2x32xf32>
    %28 = vector.extract_strided_slice %5 {offsets = [10, 0], sizes = [2, 32], strides = [1, 1]} : vector<16x32xf32> to vector<2x32xf32>
    %cst_14 = arith.constant dense<0.000000e+00> : vector<2x32xf32>
    %29 = tpu.matmul %27, %6, %cst_14 {dimension_numbers = #tpu.dot_dimension_numbers<[1], [0], [0], [1], [0, 0, 1, 1], [], []>} : vector<2x32xf32>, vector<32x32xf32>, vector<2x32xf32> -> vector<2x32xf32>
    %30 = arith.addf %28, %29 : vector<2x32xf32>
    %31 = math.tanh %30 : vector<2x32xf32>
    %32 = vector.extract_strided_slice %5 {offsets = [12, 0], sizes = [2, 32], strides = [1, 1]} : vector<16x32xf32> to vector<2x32xf32>
    %cst_15 = arith.constant dense<0.000000e+00> : vector<2x32xf32>
    %33 = tpu.matmul %31, %6, %cst_15 {dimension_numbers = #tpu.dot_dimension_numbers<[1], [0], [0], [1], [0, 0, 1, 1], [], []>} : vector<2x32xf32>, vector<32x32xf32>, vector<2x32xf32> -> vector<2x32xf32>
    %34 = arith.addf %32, %33 : vector<2x32xf32>
    %35 = math.tanh %34 : vector<2x32xf32>
    %36 = vector.extract_strided_slice %5 {offsets = [14, 0], sizes = [2, 32], strides = [1, 1]} : vector<16x32xf32> to vector<2x32xf32>
    %cst_16 = arith.constant dense<0.000000e+00> : vector<2x32xf32>
    %37 = tpu.matmul %35, %6, %cst_16 {dimension_numbers = #tpu.dot_dimension_numbers<[1], [0], [0], [1], [0, 0, 1, 1], [], []>} : vector<2x32xf32>, vector<32x32xf32>, vector<2x32xf32> -> vector<2x32xf32>
    %38 = arith.addf %36, %37 : vector<2x32xf32>
    %39 = math.tanh %38 : vector<2x32xf32>
    %c0_17 = arith.constant 0 : index
    %c0_18 = arith.constant 0 : index
    %40 = vector.load %arg8[%c0_17, %c0_18] : memref<2x32xf32, #tpu.memory_space<vmem>>, vector<2x32xf32>
    tpu.vector_store %arg8[%c0_17, %c0_18], %39 {strides = array<i32>} : memref<2x32xf32, #tpu.memory_space<vmem>>, vector<2x32xf32>,
    %c0_19 = arith.constant 0 : index
    %c0_20 = arith.constant 0 : index
    %41 = vector.load %arg5[%c0_19, %c0_20] : memref<32x8xf32, #tpu.memory_space<vmem>>, vector<32x8xf32>
    %cst_21 = arith.constant dense<0.000000e+00> : vector<2x8xf32>
    %42 = tpu.matmul %39, %41, %cst_21 {dimension_numbers = #tpu.dot_dimension_numbers<[1], [0], [0], [1], [0, 0, 1, 1], [], []>} : vector<2x32xf32>, vector<32x8xf32>, vector<2x8xf32> -> vector<2x8xf32>
    %c0_22 = arith.constant 0 : index
    %c0_23 = arith.constant 0 : index
    %43 = vector.load %arg6[%c0_22, %c0_23] : memref<1x8xf32, #tpu.memory_space<vmem>>, vector<1x8xf32>
    %44 = vector.broadcast %43 : vector<1x8xf32> to vector<2x8xf32>
    %45 = arith.addf %42, %44 : vector<2x8xf32>
    %c0_24 = arith.constant 0 : index
    %c0_25 = arith.constant 0 : index
    %46 = vector.load %arg7[%c0_24, %c0_25] : memref<2x8xf32, #tpu.memory_space<vmem>>, vector<2x8xf32>
    tpu.vector_store %arg7[%c0_24, %c0_25], %45 {strides = array<i32>} : memref<2x8xf32, #tpu.memory_space<vmem>>, vector<2x8xf32>,
    return
  }
}

</mosaic_0001>

<bundles_post_ra>
// kernel: tpu_custom_call.1
= control target key start
LH: loop header
LB: loop body
LE: loop exit
PB: predicated region body
PF: predicated region fallthrough
CT: control target
= control target key end

     0   :  { %14 = vsyncpa [#allocation3], 0  ;;  %vm47_vm0 = vcmask 1043456   ;;  %v1161_v3 = vmov 0.0|0.0   ;;  %vm40_vm1 = vcmask 31744   ;;  %s1348_s0 = inlined_call_operand.vmem [shape: f32[16,4], index: 0, kind: input, shape index: {}]   ;;  %s1349_s1 = inlined_call_operand.vmem [shape: f32[2,32], index: 1, kind: input, shape index: {}]   ;;  %s1350_s2 = inlined_call_operand.vmem [shape: f32[4,32], index: 2, kind: input, shape index: {}]   ;;  %s1351_s3 = inlined_call_operand.vmem [shape: f32[32,32], index: 3, kind: input, shape index: {}]   ;;  %s1352_s4 = inlined_call_operand.vmem [shape: f32[1,32], index: 4, kind: input, shape index: {}]   ;;  %s1353_s5 = inlined_call_operand.vmem [shape: f32[32,8], index: 5, kind: input, shape index: {}]   ;;  %s1354_s6 = inlined_call_operand.vmem [shape: f32[1,8], index: 6, kind: input, shape index: {}]   ;;  %s1355_s7 = inlined_call_operand.hbm [shape: f32[2,8], index: 7, kind: output, shape index: {0}]   ;;  %s1356_s8 = inlined_call_operand.hbm [shape: f32[2,32], index: 8, kind: output, shape index: {1}]  }
   0x1   :  { %v126_v0 = vld [vmem:[%s1351_s3] sm:$0xff]  ;;  %v127_v1 = vld [vmem:[%s1351_s3 + $0x8] sm:$0xff]  ;;  %1038 = vmatprep.subr.bf16.mxu1 %v1161_v3  ;;  %v128_v7 = vld [vmem:[%s1351_s3 + $0x10] sm:$0xff] }
   0x2   :  { %v32_v2 = vld [vmem:[%s1350_s2] sm:$0xf]  ;;  %v1221_v4 = vpack.c.bf16 %v127_v1, %v126_v0  ;;  %v31_v6 = vld [vmem:[%s1348_s0 + $0x8] sm:$0xff]  ;;  %v129_v8 = vld [vmem:[%s1351_s3 + $0x18] sm:$0xff] }
   0x3   :  { %934 = vmatprep.subr.msk.mxu0 %vm47_vm0, %v32_v2  ;;  %v30_v5 = vld [vmem:[%s1348_s0] sm:$0xff] }
   0x4   :  { %935 = vmatpush3.msk.msra.mxu0 %vm47_vm0, %v32_v2  ;;  %936 = vmatprep.mubr.msk.f32.mxu0 %vm40_vm1, %v30_v5 }
   0x5   :  { %15 = vsyncpa [#allocation5], 0  ;;  %1040 = vmatpush3.bf16.msra.mxu1 %v1221_v4  ;;  %937 = vmatmul.mubr.msk.f32.vlgmr.msra.gmra.mrb[0].mxu0 %vm40_vm1, %v31_v6  ;;  %v1236_v9 = vpack.c.bf16 %v129_v8, %v128_v7  ;;  %vm1162_vm2 = vmmov 0   ;;  %v1163_v10 = vmov 0.0   ;;  %v130_v11 = vld [vmem:[%s1349_s1] sm:$0x3] }
   0x6   :  { %1041 = vmatprep.subr.bf16.mxu1 %v1161_v3  ;;  %947 = vmatprep.mubr.msk.f32.mxu1 %vm1162_vm2, %v1163_v10  ;;  %vm131_vm3 = vcmask 261120   ;;  %v872_v12 = vld [vmem:[%s1352_s4] ss:$0 sm:$0xff]  ;;  %v758_v56 = vld [vmem:[%s1353_s5 + $0x8] sm:$0xff]  ;;  %v759_v57 = vld [vmem:[%s1353_s5 + $0x10] sm:$0xff]  ;;  %vm755_vm4 = vcmask 261126  }
   0x7   :  { %1044 = vmatprep.subr.bf16.mxu0 %v1161_v3  ;;  %958 = vmatprep.mubr.msk.f32.mxu0 %vm1162_vm2, %v1163_v10  ;;  %v757_v55 = vld [vmem:[%s1353_s5] sm:$0xff]  ;;  %v760_v59 = vld [vmem:[%s1353_s5 + $0x18] sm:$0xff]  ;;  %s1164_s26 = smov [#allocation4]  }
   0x8   :  { %1046 = vmatpush3.bf16.msra.mxu0 %v1221_v4  ;;  %v1087_v58 = vpack.c.bf16 %v758_v56, %v757_v55  ;;  %v1090_v60 = vpack.c.bf16 %v760_v59, %v759_v57  ;;  %s860_s27 = sshll.u32 %s1164_s26, 4  ;;  %s861_s27 = int_to_ptr.vmem [resolvable:$true] %s860_s27 }
   0x9   :  { %1043 = vmatpush3.bf16.msra.mxu1 %v1236_v9  ;;  %1047 = vmatprep.subr.bf16.mxu0 %v1161_v3  ;;  %s1113_s5 = scalar_lea.vmem %s861_s27, 32  ;;  %p1118_p1 = scmp.lt.s32.totalorder %s861_s27, %s861_s27 }
   0xa   :  { %1050 = vmatprep.subr.bf16.mxu1 %v1161_v3  ;;  %p1114_p0 = scmp.ne.s32.totalorder %s861_s27, %s1113_s5  ;;  %p1119_p2 = scmp.lt.s32.totalorder %s1113_s5, %s1113_s5 }
   0xc   :  { %948 = vmatmul.mubr.msk.f32.vlgmr.msra.gmra.mrb[0].mxu1 %vm131_vm3, %v130_v11  ;;  %1049 = vmatpush3.bf16.msra.mxu0 %v1236_v9  ;;  %p1120_p3 = por %p1119_p2, %p1118_p1 }
   0xd   :  { %1052 = vmatpush3.bf16.msra.mxu1 %v1221_v4  ;;  %969 = vmatprep.mubr.msk.f32.mxu1 %vm1162_vm2, %v1163_v10 }
   0xe   :  { %1053 = vmatprep.subr.bf16.mxu1 %v1161_v3  ;;  %1056 = vmatprep.subr.bf16.mxu0 %v1161_v3  ;;  %p1121_p4 = pnand %p1120_p3, %p1114_p0 }
  0x11   :  { %1055 = vmatpush3.bf16.msra.mxu1 %v1236_v9 }
  0x12   :  { %1062 = vmatprep.subr.bf16.mxu1 %v1161_v3 }
  0xd8   :  { %v938_v13 = vpop.f32.mrb[0].mxu0 }
  0xd9   :  { %v1263_v14 = vadd.f32 %v938_v13, %v872_v12  ;;  %v117_v15 = vpop.f32.mrb[1].mxu0 }
  0xda   :  { %v118_v16 = vadd.f32 %v872_v12, %v117_v15 }
  0xdf   :  { %v201_v17 = vpop.f32.mrb[0].mxu1 }
  0xe0   :  { %v205_v18 = vadd.f32 %v201_v17, %v118_v16  ;;  %v949_v19 = vpop.f32.mrb[1].mxu1 }
  0xe2   :  { %1097 = vtanh.f32 %v205_v18 }
  0xec   :  { %v1098_v20 = vpop.eup %1097 }
  0xed   :  { %959 = vmatmul.mubr.msk.f32.vlgmr.msra.gmra.mrb[2].mxu0 %vm131_vm3, %v1098_v20 }
  0xee   :  { %1058 = vmatpush3.bf16.msra.mxu0 %v1221_v4  ;;  %980 = vmatprep.mubr.msk.f32.mxu0 %vm1162_vm2, %v1163_v10 }
  0xef   :  { %1059 = vmatprep.subr.bf16.mxu0 %v1161_v3 }
  0xf2   :  { %1061 = vmatpush3.bf16.msra.mxu0 %v1236_v9 }
  0xf3   :  { %1068 = vmatprep.subr.bf16.mxu0 %v1161_v3 }
 0x1c0   :  { %v276_v21 = vpop.f32.mrb[2].mxu0 }
 0x1c1   :  { %v281_v22 = vrot.slane %v276_v21, 6  ;;  %v960_v23 = vpop.f32.mrb[3].mxu0 }
 0x1c3   :  { %v283_v24 = vadd.f32 %v281_v22, %v118_v16 }
 0x1c5   :  { %1099 = vtanh.f32 %v283_v24 }
 0x1cf   :  { %v1100_v25 = vpop.eup %1099 }
 0x1d0   :  { %v286_v26 = vrot.slane %v1100_v25, 2 }
 0x1d2   :  { %970 = vmatmul.mubr.msk.f32.vlgmr.msra.gmra.mrb[2].mxu1 %vm131_vm3, %v286_v26 }
 0x1d3   :  { %1064 = vmatpush3.bf16.msra.mxu1 %v1221_v4  ;;  %991 = vmatprep.mubr.msk.f32.mxu1 %vm1162_vm2, %v1163_v10 }
 0x1d4   :  { %1065 = vmatprep.subr.bf16.mxu1 %v1161_v3 }
 0x1d7   :  { %1067 = vmatpush3.bf16.msra.mxu1 %v1236_v9 }
 0x1d8   :  { %1074 = vmatprep.subr.bf16.mxu1 %v1161_v3 }
 0x2a5   :  { %v355_v27 = vpop.f32.mrb[2].mxu1 }
 0x2a6   :  { %v360_v28 = vrot.slane %v355_v27, 4  ;;  %v971_v29 = vpop.f32.mrb[3].mxu1 }
 0x2a8   :  { %v362_v30 = vadd.f32 %v360_v28, %v118_v16 }
 0x2aa   :  { %1101 = vtanh.f32 %v362_v30 }
 0x2b4   :  { %v1102_v31 = vpop.eup %1101 }
 0x2b5   :  { %v365_v32 = vrot.slane %v1102_v31, 4 }
 0x2b7   :  { %981 = vmatmul.mubr.msk.f32.vlgmr.msra.gmra.mrb[4].mxu0 %vm131_vm3, %v365_v32 }
 0x2b8   :  { %1070 = vmatpush3.bf16.msra.mxu0 %v1221_v4  ;;  %1002 = vmatprep.mubr.msk.f32.mxu0 %vm1162_vm2, %v1163_v10 }
 0x2b9   :  { %1071 = vmatprep.subr.bf16.mxu0 %v1161_v3 }
 0x2bc   :  { %1073 = vmatpush3.bf16.msra.mxu0 %v1236_v9 }
 0x2bd   :  { %1080 = vmatprep.subr.bf16.mxu0 %v1161_v3 }
 0x38a   :  { %v434_v33 = vpop.f32.mrb[4].mxu0 }
 0x38b   :  { %v439_v34 = vrot.slane %v434_v33, 2  ;;  %v982_v35 = vpop.f32.mrb[5].mxu0 }
 0x38d   :  { %v441_v36 = vadd.f32 %v439_v34, %v118_v16 }
 0x38f   :  { %1103 = vtanh.f32 %v441_v36 }
 0x399   :  { %v1104_v37 = vpop.eup %1103 }
 0x39a   :  { %v444_v38 = vrot.slane %v1104_v37, 6 }
 0x39c   :  { %992 = vmatmul.mubr.msk.f32.vlgmr.msra.gmra.mrb[4].mxu1 %vm131_vm3, %v444_v38 }
 0x39d   :  { %1076 = vmatpush3.bf16.msra.mxu1 %v1221_v4  ;;  %1013 = vmatprep.mubr.msk.f32.mxu1 %vm1162_vm2, %v1163_v10 }
 0x39e   :  { %1077 = vmatprep.subr.bf16.mxu1 %v1161_v3 }
 0x3a1   :  { %1079 = vmatpush3.bf16.msra.mxu1 %v1236_v9 }
 0x3a2   :  { %1086 = vmatprep.subr.bf16.mxu1 %v1161_v3 }
 0x46f   :  { %v513_v39 = vpop.f32.mrb[4].mxu1 }
 0x470   :  { %v517_v40 = vadd.f32 %v513_v39, %v1263_v14  ;;  %v993_v41 = vpop.f32.mrb[5].mxu1 }
 0x472   :  { %1105 = vtanh.f32 %v517_v40 }
 0x47c   :  { %v1106_v42 = vpop.eup %1105 }
 0x47d   :  { %1003 = vmatmul.mubr.msk.f32.vlgmr.msra.gmra.mrb[6].mxu0 %vm131_vm3, %v1106_v42 }
 0x47e   :  { %1082 = vmatpush3.bf16.msra.mxu0 %v1221_v4  ;;  %1024 = vmatprep.mubr.msk.f32.mxu0 %vm1162_vm2, %v1163_v10 }
 0x47f   :  { %1083 = vmatprep.subr.bf16.mxu0 %v1161_v3 }
 0x482   :  { %1085 = vmatpush3.bf16.msra.mxu0 %v1236_v9 }
 0x550   :  { %v588_v43 = vpop.f32.mrb[6].mxu0 }
 0x551   :  { %v593_v44 = vrot.slane %v588_v43, 6  ;;  %v1004_v45 = vpop.f32.mrb[7].mxu0 }
 0x553   :  { %v595_v46 = vadd.f32 %v593_v44, %v1263_v14 }
 0x555   :  { %1107 = vtanh.f32 %v595_v46 }
 0x55f   :  { %v1108_v47 = vpop.eup %1107 }
 0x560   :  { %v598_v48 = vrot.slane %v1108_v47, 2 }
 0x562   :  { %1014 = vmatmul.mubr.msk.f32.vlgmr.msra.gmra.mrb[6].mxu1 %vm131_vm3, %v598_v48 }
 0x563   :  { %1035 = vmatprep.mubr.msk.f32.mxu1 %vm1162_vm2, %v1163_v10  ;;  %1088 = vmatpush3.bf16.msra.mxu1 %v1087_v58 }
 0x564   :  { %1089 = vmatprep.subr.bf16.mxu1 %v1161_v3 }
 0x567   :  { %1091 = vmatpush3.bf16.msra.mxu1 %v1090_v60 }
 0x635   :  { %v667_v49 = vpop.f32.mrb[6].mxu1 }
 0x636   :  { %v672_v50 = vrot.slane %v667_v49, 4  ;;  %v1015_v51 = vpop.f32.mrb[7].mxu1 }
 0x638   :  { %v674_v52 = vadd.f32 %v672_v50, %v1263_v14 }
 0x63a   :  { %1109 = vtanh.f32 %v674_v52 }
 0x644   :  { %v1110_v53 = vpop.eup %1109 }
 0x645   :  { %v677_v54 = vrot.slane %v1110_v53, 4 }
 0x647   :  { %1025 = vmatmul.mubr.msk.f32.vlgmr.msra.gmra.mrb[8].mxu0 %vm131_vm3, %v677_v54 }
 0x71a   :  { %v746_v61 = vpop.f32.mrb[8].mxu0 }
 0x71b   :  { %v751_v62 = vrot.slane %v746_v61, 2  ;;  %v1026_v63 = vpop.f32.mrb[9].mxu0 }
 0x71d   :  { %v753_v0 = vadd.f32 %v751_v62, %v1263_v14 }
 0x71f   :  { %1111 = vtanh.f32 %v753_v0 }
 0x729   :  { %v1112_v1 = vpop.eup %1111 }
 0x72a   :  { %v769_v2 = vrot.slane %v1112_v1, 6  ;;  %756 = vst.msk [vmem:[#allocation4 - $0x6] sm:$0xc0] %vm755_vm4, %v1112_v1 }
 0x72c   :  { %1036 = vmatmul.mubr.msk.f32.vlgmr.msra.gmra.mrb[8].mxu1 %vm131_vm3, %v769_v2 }
 0x72d   :  { %1124 = shalt.err (!%p1121_p4)
}
 0x72e   :  { %s1125_s30 = scalar_lea.hbm %s1356_s8, 32 }
 0x72f   :  { %p1126_p5 = scmp.ne.s32.totalorder %s1356_s8, %s1125_s30  ;;  %p1129_p6 = scmp.lt.u32.totalorder %s1125_s30, %s1356_s8 }
 0x731   :  { %p1131_p7 = pnand %p1129_p6, %p1126_p5 }
 0x733   :  { %1134 = shalt.err (!%p1131_p7)
}
 0x734   :  { %863 = dma.vmem_to_hbm [thread:$0]  %s861_s27, 32, %s1356_s8, [#allocation5]   ;;  %v884_v3 = vld [vmem:[%s1354_s6] ss:$0 sm:$0xff]  ;;  %vm842_vm5 = vcmask 58368  }
 0x735   :  { %s1165_s2 = smov [#allocation2]  }
 0x736   :  { %s850_s17 = sshll.u32 %s1165_s2, 4  ;;  %s851_s17 = int_to_ptr.vmem [resolvable:$true] %s850_s17 }
 0x737   :  { %s1135_s0 = scalar_lea.vmem %s851_s17, 32  ;;  %p1140_p9 = scmp.lt.s32.totalorder %s851_s17, %s851_s17 }
 0x738   :  { %p1136_p8 = scmp.ne.s32.totalorder %s851_s17, %s1135_s0  ;;  %p1141_p10 = scmp.lt.s32.totalorder %s1135_s0, %s1135_s0 }
 0x73a   :  { %p1142_p11 = por %p1141_p10, %p1140_p9 }
 0x73c   :  { %p1143_p12 = pnand %p1142_p11, %p1136_p8 }
 0x7ff   :  { %v838_v4 = vpop.f32.mrb[8].mxu1 }
 0x800   :  { %v839_v5 = vadd.f32 %v884_v3, %v838_v4  ;;  %v1037_v6 = vpop.f32.mrb[9].mxu1 }
 0x802   :  { %843 = vst.msk [vmem:[#allocation2] sm:$0x3] %vm842_vm5, %v839_v5 }
 0x803   :  { %1146 = shalt.err (!%p1143_p12)
}
 0x804   :  { %s1147_s1 = scalar_lea.hbm %s1355_s7, 32 }
 0x805   :  { %p1148_p13 = scmp.ne.s32.totalorder %s1355_s7, %s1147_s1  ;;  %p1151_p0 = scmp.lt.u32.totalorder %s1147_s1, %s1355_s7 }
 0x807   :  { %p1153_p1 = pnand %p1151_p0, %p1148_p13 }
 0x809   :  { %1156 = shalt.err (!%p1153_p1)
}
 0x80a   :  { %853 = dma.vmem_to_hbm [thread:$0]  %s851_s17, 32, %s1355_s7, [#allocation3]  }
 0x80b   :  { %1157 = dma.done.wait [#allocation3], 32  }
 0x80c   :  { %1158 = vsyncadd [#allocation3], 4294967264 }
 0x80d   :  { %1159 = dma.done.wait [#allocation5], 32  }
 0x80e   :  { %1160 = vsyncadd [#allocation5], 4294967264 }
 0x80f   :  { %870 = vsyncpa [#allocation3], 1 }
 0x810   :  { %871 = vsyncpa [#allocation5], 1 }

</bundles_post_ra>
